<compile_context>
chip_gen: v6e
topology: v6e:2x2x1
jax: 0.10.0
libtpu: 0.0.40
codegen_flags: <defaults>
</compile_context>

<pallas_src>
import functools

import jax
import jax.numpy as jnp
from jax.experimental import pallas as pl
from jax.experimental.pallas import tpu as pltpu


_VMEM_LIMIT_BYTES = 48 * 1024 * 1024    # raised scoped-VMEM limit, safe on v5e/v6e/v7x
_FUSED_VMEM_BUDGET = 40 * 1024 * 1024   # budget check for the fused (weights-resident) path


def _round_up(v, m):
    return ((v + m - 1) // m) * m


# ----------------------------------------------------------------------------
# Fused whole-MLP kernel: grid = (M_tiles, L); activation resident in VMEM.
# ----------------------------------------------------------------------------
def _fused_mlp_kernel(x_ref, w_ref, b_ref, o_ref, act_ref):
    # x_ref: (tm, Fp)   w_ref: (1, Fp, Fp)   b_ref: (1, 1, Fp)
    # o_ref: (tm, Fp)   act_ref (scratch): (tm, Fp) f32
    l = pl.program_id(1)
    last = pl.num_programs(1) - 1

    @pl.when(l == 0)
    def _():
        act_ref[...] = x_ref[...].astype(jnp.float32)

    h = jnp.dot(act_ref[...], w_ref[0], preferred_element_type=jnp.float32)
    h = jnp.maximum(h + b_ref[0], 0.0)

    @pl.when(l < last)
    def _():
        act_ref[...] = h            # carry activation to the next layer

    @pl.when(l == last)
    def _():
        o_ref[...] = h.astype(o_ref.dtype)   # lane-dense final store only


def _fused_mlp_call(xp, wstack, bstack, tm):
    Mp, Fp = xp.shape
    L = wstack.shape[0]
    grid = (Mp // tm, L)
    return pl.pallas_call(
        _fused_mlp_kernel,
        out_shape=jax.ShapeDtypeStruct((Mp, Fp), jnp.float32),
        grid_spec=pltpu.PrefetchScalarGridSpec(
            num_scalar_prefetch=0,
            grid=grid,
            in_specs=[
                pl.BlockSpec((tm, Fp), lambda i, l: (i, 0)),
                pl.BlockSpec((1, Fp, Fp), lambda i, l: (l, 0, 0)),
                pl.BlockSpec((1, 1, Fp), lambda i, l: (l, 0, 0)),
            ],
            out_specs=pl.BlockSpec((tm, Fp), lambda i, l: (i, 0)),
            scratch_shapes=[pltpu.VMEM((tm, Fp), jnp.float32)],
        ),
        compiler_params=pltpu.CompilerParams(
            dimension_semantics=("parallel", "arbitrary"),
            vmem_limit_bytes=_VMEM_LIMIT_BYTES,
        ),
        cost_estimate=pl.CostEstimate(
            flops=2 * Mp * Fp * Fp * L,
            transcendentals=0,
            bytes_accessed=4 * (Mp * Fp + L * Fp * Fp + L * Fp + Mp * Fp),
        ),
    )(xp, wstack, bstack)


# ----------------------------------------------------------------------------
# Fallback: per-layer tiled (M, N, K) matmul + bias + ReLU with f32 accumulator.
# ----------------------------------------------------------------------------
def _linear_relu_tiled_kernel(x_ref, w_ref, b_ref, o_ref, acc_ref):
    k = pl.program_id(2)

    @pl.when(k == 0)
    def _():
        acc_ref[...] = jnp.zeros_like(acc_ref)

    acc_ref[...] += jnp.dot(x_ref[...], w_ref[...],
                            preferred_element_type=jnp.float32)

    @pl.when(k == pl.num_programs(2) - 1)
    def _():
        # Bias + ReLU only in the finalize branch (not per K step).
        o_ref[...] = jnp.maximum(acc_ref[...] + b_ref[...], 0.0).astype(o_ref.dtype)


def linear_relu_tiled(x, w, b, tm):
    """x: (Mp, Kp) f32 (Mp % tm == 0), w: (Kp, Np), b: (Np,), dims padded to 128."""
    Mp, Kp = x.shape
    Kp2, Np = w.shape
    assert Kp == Kp2
    tn = 256 if (Np % 256 == 0 and Np >= 256) else 128
    tk = 512 if Kp % 512 == 0 else (256 if Kp % 256 == 0 else 128)
    b2 = b.reshape(1, Np)
    grid = (Mp // tm, Np // tn, Kp // tk)
    return pl.pallas_call(
        _linear_relu_tiled_kernel,
        out_shape=jax.ShapeDtypeStruct((Mp, Np), jnp.float32),
        grid_spec=pltpu.PrefetchScalarGridSpec(
            num_scalar_prefetch=0,
            grid=grid,
            in_specs=[
                pl.BlockSpec((tm, tk), lambda i, j, k: (i, k)),
                pl.BlockSpec((tk, tn), lambda i, j, k: (k, j)),
                pl.BlockSpec((1, tn), lambda i, j, k: (0, j)),
            ],
            out_specs=pl.BlockSpec((tm, tn), lambda i, j, k: (i, j)),
            scratch_shapes=[pltpu.VMEM((tm, tn), jnp.float32)],
        ),
        compiler_params=pltpu.CompilerParams(
            dimension_semantics=("parallel", "parallel", "arbitrary"),
            vmem_limit_bytes=_VMEM_LIMIT_BYTES,
        ),
        cost_estimate=pl.CostEstimate(
            flops=2 * Mp * Np * Kp,
            transcendentals=0,
            bytes_accessed=4 * (Mp * Kp + Kp * Np + Np + Mp * Np),
        ),
    )(x, w, b2)


# ----------------------------------------------------------------------------
# Parameter init (mirrors MLP.__init__: weight ~ randn(in,out), bias ~ randn(out))
# ----------------------------------------------------------------------------
def init_mlp_params(key, input_size, hidden_layers, hidden_size, output_size):
    sizes = [(input_size, hidden_size)]
    sizes += [(hidden_size, hidden_size)] * hidden_layers
    sizes += [(hidden_size, output_size)]
    params = []
    for (fi, fo) in sizes:
        key, kw, kb = jax.random.split(key, 3)
        w = jax.random.normal(kw, (fi, fo), dtype=jnp.float32)
        b = jax.random.normal(kb, (fo,), dtype=jnp.float32)
        params.append((w, b))
    return params


# ----------------------------------------------------------------------------
# Forward driver: pads to lane/sublane-friendly shapes, picks fused vs tiled path.
# ----------------------------------------------------------------------------
def mlp_forward(x, params, input_size, *, force_path=None):
    """x: (bcz, seq_len, input_size) f32 -> (bcz, seq_len, output_size) f32."""
    bcz, seq_len, _ = x.shape
    h = x.reshape(-1, input_size)                       # (M, input_size)
    M = h.shape[0]
    out_features = params[-1][0].shape[1]
    L = len(params)

    # Common padded feature width (multiple of 128 lanes) for the fused path.
    dims = [input_size] + [w.shape[1] for (w, _) in params]
    Fp = max(_round_up(d, 128) for d in dims)

    # Row tiling: multiple of 8 sublanes, 256 for larger M.
    tm = 256 if M >= 256 else _round_up(M, 8)
    Mp = _round_up(M, tm)

    # Fused path VMEM estimate: double-buffered weight + bias, in/out tiles, scratch.
    fused_bytes = 4 * (2 * Fp * Fp + 2 * Fp + (2 + 2 + 1) * tm * Fp)
    use_fused = fused_bytes <= _FUSED_VMEM_BUDGET
    if force_path == "fused":
        use_fused = True
    elif force_path == "tiled":
        use_fused = False

    if use_fused:
        xp = jnp.zeros((Mp, Fp), jnp.float32).at[:M, :input_size].set(h)
        wstack = jnp.zeros((L, Fp, Fp), jnp.float32)
        bstack = jnp.zeros((L, 1, Fp), jnp.float32)
        for l, (w, b) in enumerate(params):
            fi, fo = w.shape
            wstack = wstack.at[l, :fi, :fo].set(w)
            bstack = bstack.at[l, 0, :fo].set(b)
        out_p = _fused_mlp_call(xp, wstack, bstack, tm)
        out = out_p[:M, :out_features]
    else:
        Kp0 = _round_up(input_size, 128)
        hp = jnp.zeros((Mp, Kp0), jnp.float32).at[:M, :input_size].set(h)
        for (w, b) in params:
            fi, fo = w.shape
            Kp = _round_up(fi, 128)
            Np = _round_up(fo, 128)
            wp = jnp.zeros((Kp, Np), jnp.float32).at[:fi, :fo].set(w)
            bp = jnp.zeros((Np,), jnp.float32).at[:fo].set(b)
            hp = linear_relu_tiled(hp, wp, bp, tm)
        out = hp[:M, :out_features]

    return out.reshape(bcz, seq_len, -1)


def mlp_forward_ref(x, params, input_size):
    """Pure-JAX reference for verification."""
    bcz, seq_len, _ = x.shape
    h = x.reshape(-1, input_size)
    for (w, b) in params:
        h = jnp.maximum(h @ w + b, 0.0)
    return h.reshape(bcz, seq_len, -1)


if __name__ == "__main__":
    # Small shapes consistent with the module's forward.
    batch, seq_len = 2, 8
    input_size, hidden_layers, hidden_size, output_size = 32, 2, 32, 16

    key = jax.random.PRNGKey(0)
    key, kx = jax.random.split(key)
    x = jax.random.normal(kx, (batch, seq_len, input_size), dtype=jnp.float32)

    params = init_mlp_params(key, input_size, hidden_layers, hidden_size, output_size)

    ref = mlp_forward_ref(x, params, input_size)

    # Primary (fused, activation-resident) path — jitted so padding/stacking fuse
    # into the surrounding XLA program and there is a single dispatch per call.
    fused_fn = jax.jit(functools.partial(mlp_forward, input_size=input_size,
                                         force_path="fused"))
    out_fused = jax.block_until_ready(fused_fn(x, params))
    assert out_fused.shape == (batch, seq_len, output_size), out_fused.shape
    assert jnp.allclose(out_fused, ref, atol=1e-4, rtol=1e-4), "fused mismatch vs reference"

    # Fallback (per-layer tiled matmul) path — exercised to verify it also runs clean.
    tiled_fn = jax.jit(functools.partial(mlp_forward, input_size=input_size,
                                         force_path="tiled"))
    out_tiled = jax.block_until_ready(tiled_fn(x, params))
    assert out_tiled.shape == (batch, seq_len, output_size), out_tiled.shape
    assert jnp.allclose(out_tiled, ref, atol=1e-4, rtol=1e-4), "tiled mismatch vs reference"

    print("KERNEL_OK")
</pallas_src>

<mosaic_0001>
module attributes {stable_mosaic.version = 11 : i64} {
  func.func @_fused_mlp_kernel(%arg0: i32, %arg1: i32, %arg2: memref<16x128xf32, #tpu.memory_space<vmem>>, %arg3: memref<1x128x128xf32, #tpu.memory_space<vmem>>, %arg4: memref<1x1x128xf32, #tpu.memory_space<vmem>>, %arg5: memref<16x128xf32, #tpu.memory_space<vmem>>, %arg6: memref<16x128xf32, #tpu.memory_space<vmem>>) attributes {dimension_semantics = [#tpu.dimension_semantics<parallel>, #tpu.dimension_semantics<arbitrary>], iteration_bounds = array<i64: 1, 4>, scalar_prefetch = 0 : i64, scratch_operands = 1 : i64, tpu.core_type = #tpu.core_type<tc>, window_params = [{transform_indices = @transform_0, window_bounds = array<i64: 16, 128>}, {transform_indices = @transform_1, window_bounds = array<i64: 1, 128, 128>}, {transform_indices = @transform_2, window_bounds = array<i64: 1, 1, 128>}, {transform_indices = @transform_3, window_bounds = array<i64: 16, 128>}]} {
    %c0_i32 = arith.constant 0 : i32
    %0 = arith.cmpi eq, %arg1, %c0_i32 : i32
    %1 = arith.extui %0 : i1 to i32
    %c0_i32_0 = arith.constant 0 : i32
    %2 = arith.cmpi ne, %1, %c0_i32_0 : i32
    scf.if %2 {
      %c0_12 = arith.constant 0 : index
      %c0_13 = arith.constant 0 : index
      %19 = vector.load %arg2[%c0_12, %c0_13] : memref<16x128xf32, #tpu.memory_space<vmem>>, vector<16x128xf32>
      %c0_14 = arith.constant 0 : index
      %c0_15 = arith.constant 0 : index
      %20 = vector.load %arg6[%c0_14, %c0_15] : memref<16x128xf32, #tpu.memory_space<vmem>>, vector<16x128xf32>
      tpu.vector_store %arg6[%c0_14, %c0_15], %19 {strides = array<i32>} : memref<16x128xf32, #tpu.memory_space<vmem>>, vector<16x128xf32>,
    } else {
    }
    %c0 = arith.constant 0 : index
    %c0_1 = arith.constant 0 : index
    %3 = vector.load %arg6[%c0, %c0_1] : memref<16x128xf32, #tpu.memory_space<vmem>>, vector<16x128xf32>
    %c0_2 = arith.constant 0 : index
    %c0_3 = arith.constant 0 : index
    %c0_4 = arith.constant 0 : index
    %4 = vector.load %arg3[%c0_2, %c0_3, %c0_4] : memref<1x128x128xf32, #tpu.memory_space<vmem>>, vector<1x128x128xf32>
    %5 = vector.shape_cast %4 : vector<1x128x128xf32> to vector<128x128xf32>
    %cst = arith.constant dense<0.000000e+00> : vector<16x128xf32>
    %6 = tpu.matmul %3, %5, %cst {dimension_numbers = #tpu.dot_dimension_numbers<[1], [0], [0], [1], [0, 0, 1, 1], [], []>} : vector<16x128xf32>, vector<128x128xf32>, vector<16x128xf32> -> vector<16x128xf32>
    %c0_5 = arith.constant 0 : index
    %c0_6 = arith.constant 0 : index
    %c0_7 = arith.constant 0 : index
    %7 = vector.load %arg4[%c0_5, %c0_6, %c0_7] : memref<1x1x128xf32, #tpu.memory_space<vmem>>, vector<1x1x128xf32>
    %8 = vector.shape_cast %7 : vector<1x1x128xf32> to vector<1x128xf32>
    %9 = vector.broadcast %8 : vector<1x128xf32> to vector<16x128xf32>
    %10 = arith.addf %6, %9 : vector<16x128xf32>
    %cst_8 = arith.constant 0.000000e+00 : f32
    %11 = vector.broadcast %cst_8 : f32 to vector<16x128xf32>
    %12 = arith.maximumf %10, %11 : vector<16x128xf32>
    %c3_i32 = arith.constant 3 : i32
    %13 = arith.cmpi slt, %arg1, %c3_i32 : i32
    %14 = arith.extui %13 : i1 to i32
    %c0_i32_9 = arith.constant 0 : i32
    %15 = arith.cmpi ne, %14, %c0_i32_9 : i32
    scf.if %15 {
      %c0_12 = arith.constant 0 : index
      %c0_13 = arith.constant 0 : index
      %19 = vector.load %arg6[%c0_12, %c0_13] : memref<16x128xf32, #tpu.memory_space<vmem>>, vector<16x128xf32>
      tpu.vector_store %arg6[%c0_12, %c0_13], %12 {strides = array<i32>} : memref<16x128xf32, #tpu.memory_space<vmem>>, vector<16x128xf32>,
    } else {
    }
    %c3_i32_10 = arith.constant 3 : i32
    %16 = arith.cmpi eq, %arg1, %c3_i32_10 : i32
    %17 = arith.extui %16 : i1 to i32
    %c0_i32_11 = arith.constant 0 : i32
    %18 = arith.cmpi ne, %17, %c0_i32_11 : i32
    scf.if %18 {
      %c0_12 = arith.constant 0 : index
      %c0_13 = arith.constant 0 : index
      %19 = vector.load %arg5[%c0_12, %c0_13] : memref<16x128xf32, #tpu.memory_space<vmem>>, vector<16x128xf32>
      tpu.vector_store %arg5[%c0_12, %c0_13], %12 {strides = array<i32>} : memref<16x128xf32, #tpu.memory_space<vmem>>, vector<16x128xf32>,
    } else {
    }
    return
  }
  func.func @transform_0(%arg0: i32, %arg1: i32) -> (i32, i32) {
    %c0_i32 = arith.constant 0 : i32
    %c0_i32_0 = arith.constant 0 : i32
    return %arg0, %c0_i32 : i32, i32
  }
  func.func @transform_1(%arg0: i32, %arg1: i32) -> (i32, i32, i32) {
    %c0_i32 = arith.constant 0 : i32
    %c0_i32_0 = arith.constant 0 : i32
    %c0_i32_1 = arith.constant 0 : i32
    return %arg1, %c0_i32, %c0_i32_0 : i32, i32, i32
  }
  func.func @transform_2(%arg0: i32, %arg1: i32) -> (i32, i32, i32) {
    %c0_i32 = arith.constant 0 : i32
    %c0_i32_0 = arith.constant 0 : i32
    %c0_i32_1 = arith.constant 0 : i32
    return %arg1, %c0_i32, %c0_i32_0 : i32, i32, i32
  }
  func.func @transform_3(%arg0: i32, %arg1: i32) -> (i32, i32) {
    %c0_i32 = arith.constant 0 : i32
    %c0_i32_0 = arith.constant 0 : i32
    return %arg0, %c0_i32 : i32, i32
  }
}

</mosaic_0001>

<bundles_post_ra>
// kernel: mlp_forward.1
= control target key start
LH: loop header
LB: loop body
LE: loop exit
PB: predicated region body
PF: predicated region fallthrough
CT: control target
= control target key end

     0   :  { %s565_s12 = smov 0   ;;  %s567_s13 = smov 0   ;;  %s644_s0 = inlined_call_operand.vmem [shape: f32[16,128], index: 0, kind: input, shape index: {}]   ;;  %s645_s1 = inlined_call_operand.vmem [shape: f32[4,128,128], index: 1, kind: input, shape index: {}]   ;;  %s646_s2 = inlined_call_operand.vmem [shape: f32[4,1,128], index: 2, kind: input, shape index: {}]   ;;  %s647_s3 = inlined_call_operand.vmem [shape: f32[16,128], index: 3, kind: output, shape index: {}]  }
   0x1   :  { %s569_s14 = smov 0  }
   0x2 LB: > { %s22_s15 = sadd.s32 1, %s539_s13  ;;  %p432_p0 = scmp.ge.s32.totalorder %s543_s14, 1  ;;  %s543_s14 = sphi %s569_s14, %s13_s14   ;;  %s539_s13 = sphi %s567_s13, %s649_s13   ;;  %s535_s12 = sphi %s565_s12, %s648_s12  }
   0x3   : > { %p23_p1 = scmp.ge.s32.totalorder %s22_s15, 4  ;;  %p168_p2 = scmp.lt.s32.totalorder %s543_s14, 5 }
   0x5   : > { %s651_s15 = smov (%p23_p1, %s22_s15), 0  ;;  %p169_p3 = pnand %p432_p0, %p168_p2 }
   0x6   : > { %p206_p4 = scmp.lt.s32.totalorder (!%p169_p3), %s535_s12, 3  ;;  %p435_p5 = scmp.ne.s32.totalorder (!%p169_p3), %s535_s12, 0 }
   0x7   : > { %172 = sbr.rel (%p169_p3) target bundleno = 261 (0x105), region = 32 }
   0xc   : > { %s587_s16 = scalar_select %p206_p4, %s535_s12, 3 }
   0xd   : > { %223 = sbr.rel (%p435_p5) target bundleno = 20 (0x14), region = 36 }
   0xe   : > { %s443_s17 = sshll.u32 %s587_s16, 7  ;;  %s213_s20 = scalar_lea.vmem %s646_s2, %s587_s16 }
   0xf   : > { %s597_s23 = scalar_lea.vmem %s645_s1, %s443_s17 }
  0x12   : > { %v224_v0 = vld [vmem:[%s644_s0] sm:$0xff]  ;;  %v225_v1 = vld [vmem:[%s644_s0 + $0x8] sm:$0xff] }
  0x13   : > { %226 = vst [vmem:[#allocation2] sm:$0xff] %v224_v0  ;;  %227 = vst [vmem:[#allocation2 + $0x8] sm:$0xff] %v225_v1 }
  0x14 PF: > { %v245_v2 = vld [vmem:[%s597_s23 + $0x78] sm:$0xff]  ;;  %v244_v3 = vld [vmem:[%s597_s23 + $0x70] sm:$0xff]  ;;  %v243_v4 = vld [vmem:[%s597_s23 + $0x68] sm:$0xff]  ;;  %p437_p6 = scmp.ge.s32.totalorder %s535_s12, 3 }
  0x15   : > { %462 = vmatprep.subr.mxu0 %v245_v2  ;;  %v242_v5 = vld [vmem:[%s597_s23 + $0x60] sm:$0xff]  ;;  %v241_v7 = vld [vmem:[%s597_s23 + $0x58] sm:$0xff]  ;;  %v240_v8 = vld [vmem:[%s597_s23 + $0x50] sm:$0xff] }
  0x16   : > { %463 = vmatpush3.msra.mxu0 %v245_v2  ;;  %v239_v9 = vld [vmem:[%s597_s23 + $0x48] sm:$0xff]  ;;  %v238_v10 = vld [vmem:[%s597_s23 + $0x40] sm:$0xff]  ;;  %v237_v11 = vld [vmem:[%s597_s23 + $0x38] sm:$0xff] }
  0x17   : > { %464 = vmatprep.subr.mxu0 %v244_v3  ;;  %v236_v12 = vld [vmem:[%s597_s23 + $0x30] sm:$0xff]  ;;  %v235_v13 = vld [vmem:[%s597_s23 + $0x28] sm:$0xff]  ;;  %v234_v14 = vld [vmem:[%s597_s23 + $0x20] sm:$0xff] }
  0x18   : > { %465 = vmatpush3.msra.mxu0 %v244_v3  ;;  %v233_v15 = vld [vmem:[%s597_s23 + $0x18] sm:$0xff]  ;;  %v232_v16 = vld [vmem:[%s597_s23 + $0x10] sm:$0xff]  ;;  %v231_v17 = vld [vmem:[%s597_s23 + $0x8] sm:$0xff] }
  0x19   : > { %466 = vmatprep.subr.mxu0 %v243_v4  ;;  %v230_v18 = vld [vmem:[%s597_s23] sm:$0xff] }
  0x1a   : > { %v228_v6 = vld [vmem:[#allocation2] sm:$0xff]  ;;  %467 = vmatpush3.msra.mxu0 %v243_v4  ;;  %v229_v19 = vld [vmem:[#allocation2 + $0x8] sm:$0xff] }
  0x1b   : > { %494 = vmatprep.mubr.f32.mxu0 %v228_v6  ;;  %468 = vmatprep.subr.mxu0 %v242_v5  ;;  %v436_v20 = vld [vmem:[%s213_s20] ss:$0 sm:$0xff] }
  0x1c   : > { %469 = vmatpush3.msra.mxu0 %v242_v5 }
  0x1d   : > { %470 = vmatprep.subr.mxu0 %v241_v7 }
  0x1e   : > { %471 = vmatpush3.msra.mxu0 %v241_v7 }
  0x1f   : > { %472 = vmatprep.subr.mxu0 %v240_v8 }
  0x20   : > { %473 = vmatpush3.msra.mxu0 %v240_v8 }
  0x21   : > { %474 = vmatprep.subr.mxu0 %v239_v9 }
  0x22   : > { %475 = vmatpush3.msra.mxu0 %v239_v9 }
  0x23   : > { %476 = vmatprep.subr.mxu0 %v238_v10 }
  0x24   : > { %477 = vmatpush3.msra.mxu0 %v238_v10 }
  0x25   : > { %478 = vmatprep.subr.mxu0 %v237_v11 }
  0x26   : > { %479 = vmatpush3.msra.mxu0 %v237_v11 }
  0x27   : > { %480 = vmatprep.subr.mxu0 %v236_v12 }
  0x28   : > { %481 = vmatpush3.msra.mxu0 %v236_v12 }
  0x29   : > { %482 = vmatprep.subr.mxu0 %v235_v13 }
  0x2a   : > { %483 = vmatpush3.msra.mxu0 %v235_v13 }
  0x2b   : > { %484 = vmatprep.subr.mxu0 %v234_v14 }
  0x2c   : > { %485 = vmatpush3.msra.mxu0 %v234_v14 }
  0x2d   : > { %486 = vmatprep.subr.mxu0 %v233_v15 }
  0x2e   : > { %487 = vmatpush3.msra.mxu0 %v233_v15 }
  0x2f   : > { %488 = vmatprep.subr.mxu0 %v232_v16 }
  0x30   : > { %489 = vmatpush3.msra.mxu0 %v232_v16 }
  0x31   : > { %490 = vmatprep.subr.mxu0 %v231_v17 }
  0x32   : > { %491 = vmatpush3.msra.mxu0 %v231_v17 }
  0x33   : > { %492 = vmatprep.subr.mxu0 %v230_v18 }
  0x34   : > { %493 = vmatpush3.msra.mxu0 %v230_v18 }
  0x35   : > { %495 = vmatmul.mubr.f32.vlgmr.msra.gmra.mxu0 %v229_v19 }
  0xf5   : > { %v496_v21 = vpop.f32.mrf.mxu0 }
  0xf6   : > { %v325_v22 = vadd.f32 %v496_v21, %v436_v20  ;;  %333 = sbr.rel (%p437_p6) target bundleno = 253 (0xfd), region = 40 }
  0xf7   : > { %v319_v23 = vpop.f32.mrf.mxu0 }
  0xf8   : > { %v329_v24 = vmax.f32 %v325_v22, 0.0  ;;  %v320_v25 = vadd.f32 %v436_v20, %v319_v23 }
  0xfa   : > { %v328_v26 = vmax.f32 %v320_v25, 0.0 }
  0xfb   : > { %335 = vst [vmem:[#allocation2 + $0x8] sm:$0xff] %v329_v24 }
  0xfc   : > { %334 = vst [vmem:[#allocation2] sm:$0xff] %v328_v26 }
  0xfd PF: > { %p438_p7 = scmp.ne.s32.totalorder %s535_s12, 3 }
  0xff   : > { %339 = sbr.rel (%p438_p7) target bundleno = 261 (0x105), region = 44 }
 0x104   : > { %340 = vst [vmem:[%s647_s3] sm:$0xff] %v328_v26  ;;  %341 = vst [vmem:[%s647_s3 + $0x8] sm:$0xff] %v329_v24 }
 0x105 PF: > { %s13_s14 = sadd.s32 1, %s543_s14   ;;  %s648_s12 = smov %s539_s13 }
 0x106   : > { %p10_p8 = scmp.ge.s32.totalorder %s13_s14, 6   ;;  %s649_s13 = smov %s651_s15 }
 0x108   :  { %12 = sbr.rel (!%p10_p8) target bundleno = 2 (0x2), region = 80 }

</bundles_post_ra>
